<compile_context>
chip_gen: v7x
topology: tpu7x:2x2x1
jax: 0.10.0
libtpu: 0.0.40
codegen_flags: <defaults>
</compile_context>

<pallas_src>
import functools

import jax
import jax.numpy as jnp
import numpy as np
from jax.experimental import pallas as pl
from jax.experimental.pallas import tpu as pltpu


def _round_up(x, m):
    return ((x + m - 1) // m) * m


@functools.lru_cache(maxsize=1)
def _tpu_vmem_bytes():
    try:
        return int(pltpu.get_tpu_info().vmem_capacity_bytes)
    except Exception:
        return 64 * 1024 * 1024          # conservative (v7x-class) default


def _chip_budgets():
    """(block_budget, vmem_limit_cap, kron_max_hw) sized per chip generation."""
    vmem = _tpu_vmem_bytes()
    if vmem >= 100 * 1024 * 1024:        # v5e / v6e class: 128 MiB VMEM per core
        return 64 * 1024 * 1024, 96 * 1024 * 1024, 2048
    return 22 * 1024 * 1024, 48 * 1024 * 1024, 1024   # v7x class: 64 MiB VMEM


def _vmem_limit_bytes(footprint, cap):
    return int(min(max(footprint + 8 * 1024 * 1024, 32 * 1024 * 1024), cap))


def _op_dtype(x_dtype):
    # 0/1 band operators are exact in bf16; keep bf16 inputs on the bf16 MXU path.
    return "bfloat16" if x_dtype == jnp.bfloat16 else "float32"


@functools.lru_cache(maxsize=32)
def _band_operator(n, r, dtype_name):
    """Folded (cumsum o diff) pair: banded box-sum operator with entries in {0,1}."""
    i = np.arange(n)
    band = np.abs(i[:, None] - i[None, :]) <= r
    return jnp.asarray(band, dtype=dtype_name)


@functools.lru_cache(maxsize=32)
def _kron_operator(h, w, r, hw_pad, dtype_name):
    i = np.arange(h)
    j = np.arange(w)
    ah = (np.abs(i[:, None] - i[None, :]) <= r).astype(np.float32)
    aw = (np.abs(j[:, None] - j[None, :]) <= r).astype(np.float32)
    k = np.kron(ah, aw)                                  # (H*W, H*W), symmetric 0/1
    kp = np.zeros((hw_pad, hw_pad), np.float32)
    kp[: h * w, : h * w] = k
    return jnp.asarray(kp, dtype=dtype_name)


def _const_spec(shape, index_map, single_buffer):
    # Constant operand (index_map never changes): request a single VMEM buffer.
    if single_buffer:
        return pl.BlockSpec(shape, index_map, pipeline_mode=pl.Buffered(1))
    return pl.BlockSpec(shape, index_map)


# ----------------------------- kron path (small frames) ----------------------
def _box_kron_kernel(x_ref, k_ref, o_ref):
    y = jnp.dot(x_ref[0], k_ref[...], preferred_element_type=jnp.float32)
    o_ref[0] = y.astype(o_ref.dtype)


def _box_filter_kron(x_flat, h, w, r):
    nc, hw = x_flat.shape
    hw_pad = _round_up(hw, 128)                          # lane-dense output stores
    budget, cap, _ = _chip_budgets()
    itemsize = x_flat.dtype.itemsize

    k_op = _kron_operator(h, w, r, hw_pad, _op_dtype(x_flat.dtype))
    k_bytes = hw_pad * hw_pad * k_op.dtype.itemsize

    # Per-row VMEM: input (x2 buffers) + output (x2) + ~2 f32 temporaries.
    per_row = 4 * hw_pad * itemsize + 2 * hw_pad * 4
    avail = max(budget - 2 * k_bytes, 8 * per_row)
    rows = max(8, (min(int(avail // per_row), 1024) // 8) * 8)
    rows = min(rows, _round_up(nc, 8))
    if rows >= nc and nc >= 16:          # keep >=2 steps (megacore) only if work splits cleanly
        rows = _round_up(pl.cdiv(nc, 2), 8)
    steps = pl.cdiv(nc, rows)
    nc_pad = steps * rows

    xp = jnp.pad(x_flat, ((0, nc_pad - nc), (0, hw_pad - hw)))
    x3 = xp.reshape(steps, rows, hw_pad)

    def run(single_buffer_consts):
        kfac = 1 if single_buffer_consts else 2
        footprint = per_row * rows + kfac * k_bytes
        return pl.pallas_call(
            _box_kron_kernel,
            out_shape=jax.ShapeDtypeStruct((steps, rows, hw_pad), x_flat.dtype),
            grid_spec=pltpu.PrefetchScalarGridSpec(
                num_scalar_prefetch=0,
                grid=(steps,),
                in_specs=[
                    pl.BlockSpec((1, rows, hw_pad), lambda i: (i, 0, 0)),
                    _const_spec((hw_pad, hw_pad), lambda i: (0, 0),
                                single_buffer_consts),
                ],
                out_specs=pl.BlockSpec((1, rows, hw_pad), lambda i: (i, 0, 0)),
            ),
            compiler_params=pltpu.CompilerParams(
                dimension_semantics=("parallel",),
                vmem_limit_bytes=_vmem_limit_bytes(footprint, cap)),
        )(x3, k_op)

    try:
        out = run(True)
    except Exception:                    # pipeline_mode unsupported -> default buffering
        out = run(False)
    return out.reshape(nc_pad, hw_pad)[:nc, :hw]


# --------------------------- spatial path (larger frames) --------------------
def _box_spatial_kernel(x_ref, ah_ref, aw_ref, o_ref):
    bb, hp, wp = x_ref.shape
    # W-side box sum: one lane-dense (B*Hp, Wp) @ (Wp, Wp) MXU matmul.
    z = jnp.dot(x_ref[...].reshape(bb * hp, wp), aw_ref[...],
                preferred_element_type=jnp.float32).reshape(bb, hp, wp)
    # H-side box sum: A_h is symmetric, so fold the whole batch into ONE
    # (B*Wp, Hp) @ (Hp, Hp) matmul instead of per-slice (Hp,Hp)@(Hp,Wp) dots.
    zt = jnp.swapaxes(z, 1, 2).reshape(bb * wp, hp)
    y = jnp.dot(zt, ah_ref[...], preferred_element_type=jnp.float32)
    y = jnp.swapaxes(y.reshape(bb, wp, hp), 1, 2)
    o_ref[...] = y.astype(o_ref.dtype)


def _pick_spatial_batch(nc, hp, wp, itemsize, budget, const_bytes):
    slice_bytes = hp * wp * itemsize
    f32_slice = hp * wp * 4
    per_slice = 4 * slice_bytes + 3 * f32_slice          # in x2 + out x2 + f32 temps
    avail = max(budget - const_bytes, per_slice)
    b = max(1, int(avail // per_slice))
    b = min(b, nc, max(1, (8 * 1024 * 1024) // slice_bytes))   # <= ~8 MiB input block
    steps = pl.cdiv(nc, b)
    if steps == 1 and nc >= 2 and (nc // 2) * slice_bytes >= (1 << 20):
        b = pl.cdiv(nc, 2)               # >=2 parallel steps only when blocks stay big
    return int(b)


def _box_filter_spatial(x3, h, w, r):
    nc = x3.shape[0]
    hp = _round_up(h, 8)                                 # sublane-aligned rows
    wp = _round_up(w, 128)                               # lane-dense columns
    budget, cap, _ = _chip_budgets()
    itemsize = x3.dtype.itemsize
    dt = _op_dtype(x3.dtype)

    # Band operators over the padded extents: zero-padded rows/cols contribute 0,
    # so edge-clipped windows of the original frame are reproduced exactly.
    ah = _band_operator(hp, r, dt)
    aw = _band_operator(wp, r, dt)
    const_bytes = 2 * (hp * hp + wp * wp) * ah.dtype.itemsize

    b = _pick_spatial_batch(nc, hp, wp, itemsize, budget, const_bytes)
    steps = pl.cdiv(nc, b)
    nc_pad = steps * b
    xp = jnp.pad(x3, ((0, nc_pad - nc), (0, hp - h), (0, wp - w)))

    def run(single_buffer_consts):
        cfac = 1 if single_buffer_consts else 2
        footprint = (4 * b * hp * wp * itemsize + 3 * b * hp * wp * 4
                     + cfac * (hp * hp + wp * wp) * ah.dtype.itemsize)
        return pl.pallas_call(
            _box_spatial_kernel,
            out_shape=jax.ShapeDtypeStruct((nc_pad, hp, wp), x3.dtype),
            grid_spec=pltpu.PrefetchScalarGridSpec(
                num_scalar_prefetch=0,
                grid=(steps,),
                in_specs=[
                    pl.BlockSpec((b, hp, wp), lambda i: (i, 0, 0)),
                    _const_spec((hp, hp), lambda i: (0, 0), single_buffer_consts),
                    _const_spec((wp, wp), lambda i: (0, 0), single_buffer_consts),
                ],
                out_specs=pl.BlockSpec((b, hp, wp), lambda i: (i, 0, 0)),
            ),
            compiler_params=pltpu.CompilerParams(
                dimension_semantics=("parallel",),
                vmem_limit_bytes=_vmem_limit_bytes(footprint, cap)),
        )(xp, ah, aw)

    try:
        out = run(True)
    except Exception:                    # pipeline_mode unsupported -> default buffering
        out = run(False)
    return out[:nc, :h, :w]


def box_filter(x, r, *, force_path=None):
    """BoxFilter.forward(x) for NCHW input: radius-r box sum with edge-clipped windows."""
    assert x.ndim == 4
    n, c, h, w = x.shape
    assert h > 2 * r and w > 2 * r
    nc = n * c
    _, _, kron_max_hw = _chip_budgets()
    hw_pad = _round_up(h * w, 128)
    if force_path is None:
        use_kron = hw_pad <= kron_max_hw
    else:
        use_kron = (force_path == "kron")
    if use_kron:
        out = _box_filter_kron(x.reshape(nc, h * w), h, w, r)
    else:
        out = _box_filter_spatial(x.reshape(nc, h, w), h, w, r)
    return out.reshape(n, c, h, w)


# ---- pure-JAX reference mirroring the PyTorch diff_x / diff_y / cumsum ------
def _diff_x_ref(t, r):
    left = t[:, :, r:2 * r + 1]
    middle = t[:, :, 2 * r + 1:] - t[:, :, :-2 * r - 1]
    right = t[:, :, -1:] - t[:, :, -2 * r - 1:-r - 1]
    return jnp.concatenate([left, middle, right], axis=2)


def _diff_y_ref(t, r):
    left = t[:, :, :, r:2 * r + 1]
    middle = t[:, :, :, 2 * r + 1:] - t[:, :, :, :-2 * r - 1]
    right = t[:, :, :, -1:] - t[:, :, :, -2 * r - 1:-r - 1]
    return jnp.concatenate([left, middle, right], axis=3)


def box_filter_ref(x, r):
    return _diff_y_ref(jnp.cumsum(_diff_x_ref(jnp.cumsum(x, axis=2), r), axis=3), r)


if __name__ == "__main__":
    key = jax.random.PRNGKey(0)
    k1, k2 = jax.random.split(key)

    # Test 1: BoxFilter(r=2) at 16x16 -> kron path (single lane-dense matmul, HW=256).
    x1 = jax.random.normal(k1, (2, 4, 16, 16), dtype=jnp.float32)
    out1 = jax.block_until_ready(box_filter(x1, 2))
    ref1 = box_filter_ref(x1, 2)
    assert out1.shape == ref1.shape == (2, 4, 16, 16)
    assert jnp.allclose(out1, ref1, rtol=1e-4, atol=1e-4), float(
        jnp.max(jnp.abs(out1 - ref1)))

    # Test 2: BoxFilter(r=3) at 32x32 -> kron path by default (HW=1024 lanes).
    x2 = jax.random.normal(k2, (2, 4, 32, 32), dtype=jnp.float32)
    out2 = jax.block_until_ready(box_filter(x2, 3))
    ref2 = box_filter_ref(x2, 3)
    assert out2.shape == ref2.shape == (2, 4, 32, 32)
    assert jnp.allclose(out2, ref2, rtol=1e-4, atol=1e-4), float(
        jnp.max(jnp.abs(out2 - ref2)))

    # Test 3: same input forced onto the batched spatial (A_h @ x @ A_w) path
    # (W zero-padded to a lane-dense 128) to exercise the large-frame code path.
    out3 = jax.block_until_ready(box_filter(x2, 3, force_path="spatial"))
    assert out3.shape == ref2.shape
    assert jnp.allclose(out3, ref2, rtol=1e-4, atol=1e-4), float(
        jnp.max(jnp.abs(out3 - ref2)))

    print("KERNEL_OK")
</pallas_src>

<mosaic_0001>
module attributes {stable_mosaic.version = 11 : i64} {
  func.func @_box_kron_kernel(%arg0: i32, %arg1: memref<1x8x256xf32, #tpu.memory_space<vmem>>, %arg2: memref<256x256xf32, #tpu.memory_space<vmem>>, %arg3: memref<1x8x256xf32, #tpu.memory_space<vmem>>) attributes {dimension_semantics = [#tpu.dimension_semantics<parallel>], iteration_bounds = array<i64: 1>, scalar_prefetch = 0 : i64, scratch_operands = 0 : i64, tpu.core_type = #tpu.core_type<tc>, window_params = [{transform_indices = @transform_0, window_bounds = array<i64: 1, 8, 256>}, {pipeline_mode = #tpu.pipeline_mode<synchronous>, transform_indices = @transform_1, window_bounds = array<i64: 256, 256>}, {transform_indices = @transform_2, window_bounds = array<i64: 1, 8, 256>}]} {
    %c0 = arith.constant 0 : index
    %c0_0 = arith.constant 0 : index
    %c0_1 = arith.constant 0 : index
    %0 = vector.load %arg1[%c0, %c0_0, %c0_1] : memref<1x8x256xf32, #tpu.memory_space<vmem>>, vector<1x8x256xf32>
    %1 = vector.shape_cast %0 : vector<1x8x256xf32> to vector<8x256xf32>
    %c0_2 = arith.constant 0 : index
    %c0_3 = arith.constant 0 : index
    %2 = vector.load %arg2[%c0_2, %c0_3] : memref<256x256xf32, #tpu.memory_space<vmem>>, vector<256x256xf32>
    %cst = arith.constant dense<0.000000e+00> : vector<8x256xf32>
    %3 = tpu.matmul %1, %2, %cst {dimension_numbers = #tpu.dot_dimension_numbers<[1], [0], [0], [1], [0, 0, 1, 1], [], []>} : vector<8x256xf32>, vector<256x256xf32>, vector<8x256xf32> -> vector<8x256xf32>
    %c0_4 = arith.constant 0 : index
    %c0_5 = arith.constant 0 : index
    %c0_6 = arith.constant 0 : index
    %4 = vector.load %arg3[%c0_4, %c0_5, %c0_6] : memref<1x8x256xf32, #tpu.memory_space<vmem>>, vector<1x8x256xf32>
    %5 = vector.shape_cast %4 : vector<1x8x256xf32> to vector<8x256xf32>
    %6 = vector.shape_cast %3 : vector<8x256xf32> to vector<1x8x256xf32>
    tpu.vector_store %arg3[%c0_4, %c0_5, %c0_6], %6 {strides = array<i32>} : memref<1x8x256xf32, #tpu.memory_space<vmem>>, vector<1x8x256xf32>,
    return
  }
  func.func @transform_0(%arg0: i32) -> (i32, i32, i32) {
    %c0_i32 = arith.constant 0 : i32
    %c0_i32_0 = arith.constant 0 : i32
    %c0_i32_1 = arith.constant 0 : i32
    return %arg0, %c0_i32, %c0_i32_0 : i32, i32, i32
  }
  func.func @transform_1(%arg0: i32) -> (i32, i32) {
    %c0_i32 = arith.constant 0 : i32
    %c0_i32_0 = arith.constant 0 : i32
    %c0_i32_1 = arith.constant 0 : i32
    return %c0_i32, %c0_i32_0 : i32, i32
  }
  func.func @transform_2(%arg0: i32) -> (i32, i32, i32) {
    %c0_i32 = arith.constant 0 : i32
    %c0_i32_0 = arith.constant 0 : i32
    %c0_i32_1 = arith.constant 0 : i32
    return %arg0, %c0_i32, %c0_i32_0 : i32, i32, i32
  }
}

module attributes {stable_mosaic.version = 11 : i64} {
  func.func @_box_kron_kernel(%arg0: i32, %arg1: memref<1x8x256xf32, #tpu.memory_space<vmem>>, %arg2: memref<256x256xf32, #tpu.memory_space<vmem>>, %arg3: memref<1x8x256xf32, #tpu.memory_space<vmem>>) attributes {dimension_semantics = [#tpu.dimension_semantics<parallel>], iteration_bounds = array<i64: 1>, scalar_prefetch = 0 : i64, scratch_operands = 0 : i64, tpu.core_type = #tpu.core_type<tc>, window_params = [{transform_indices = @transform_0, window_bounds = array<i64: 1, 8, 256>}, {pipeline_mode = #tpu.pipeline_mode<synchronous>, transform_indices = @transform_1, window_bounds = array<i64: 256, 256>}, {transform_indices = @transform_2, window_bounds = array<i64: 1, 8, 256>}]} {
    %c0 = arith.constant 0 : index
    %c0_0 = arith.constant 0 : index
    %c0_1 = arith.constant 0 : index
    %0 = vector.load %arg1[%c0, %c0_0, %c0_1] : memref<1x8x256xf32, #tpu.memory_space<vmem>>, vector<1x8x256xf32>
    %1 = vector.shape_cast %0 : vector<1x8x256xf32> to vector<8x256xf32>
    %c0_2 = arith.constant 0 : index
    %c0_3 = arith.constant 0 : index
    %2 = vector.load %arg2[%c0_2, %c0_3] : memref<256x256xf32, #tpu.memory_space<vmem>>, vector<256x256xf32>
    %cst = arith.constant dense<0.000000e+00> : vector<8x256xf32>
    %3 = tpu.matmul %1, %2, %cst {dimension_numbers = #tpu.dot_dimension_numbers<[1], [0], [0], [1], [0, 0, 1, 1], [], []>} : vector<8x256xf32>, vector<256x256xf32>, vector<8x256xf32> -> vector<8x256xf32>
    %c0_4 = arith.constant 0 : index
    %c0_5 = arith.constant 0 : index
    %c0_6 = arith.constant 0 : index
    %4 = vector.load %arg3[%c0_4, %c0_5, %c0_6] : memref<1x8x256xf32, #tpu.memory_space<vmem>>, vector<1x8x256xf32>
    %5 = vector.shape_cast %4 : vector<1x8x256xf32> to vector<8x256xf32>
    %6 = vector.shape_cast %3 : vector<8x256xf32> to vector<1x8x256xf32>
    tpu.vector_store %arg3[%c0_4, %c0_5, %c0_6], %6 {strides = array<i32>} : memref<1x8x256xf32, #tpu.memory_space<vmem>>, vector<1x8x256xf32>,
    return
  }
  func.func @transform_0(%arg0: i32) -> (i32, i32, i32) {
    %c0_i32 = arith.constant 0 : i32
    %c0_i32_0 = arith.constant 0 : i32
    %c0_i32_1 = arith.constant 0 : i32
    return %arg0, %c0_i32, %c0_i32_0 : i32, i32, i32
  }
  func.func @transform_1(%arg0: i32) -> (i32, i32) {
    %c0_i32 = arith.constant 0 : i32
    %c0_i32_0 = arith.constant 0 : i32
    %c0_i32_1 = arith.constant 0 : i32
    return %c0_i32, %c0_i32_0 : i32, i32
  }
  func.func @transform_2(%arg0: i32) -> (i32, i32, i32) {
    %c0_i32 = arith.constant 0 : i32
    %c0_i32_0 = arith.constant 0 : i32
    %c0_i32_1 = arith.constant 0 : i32
    return %arg0, %c0_i32, %c0_i32_0 : i32, i32, i32
  }
}

</mosaic_0001>

<bundles_post_ra>
// kernel: tpu_custom_call.1
= control target key start
LH: loop header
LB: loop body
LE: loop exit
PB: predicated region body
PF: predicated region fallthrough
CT: control target
= control target key end

     0   :  { %7 = vsyncpa [#allocation3], 0  ;;  %s397_s0 = inlined_call_operand.hbm [shape: f32[1,8,256], index: 0, kind: input, shape index: {}]   ;;  %s398_s1 = inlined_call_operand.hbm [shape: f32[256,256], index: 1, kind: input, shape index: {}]   ;;  %s399_s2 = inlined_call_operand.hbm [shape: f32[1,8,256], index: 2, kind: output, shape index: {}]  }
   0x1   :  { %8 = vsyncpa [#allocation6], 0 }
   0x2   :  { %9 = vsyncpa [#allocation4], 0  ;;  %s334_s9 = smov [#allocation2]   ;;  %s335_s11 = smov [#allocation5]  }
   0x3   :  { %s16_s10 = sshll.u32 %s334_s9, 4  ;;  %s25_s12 = sshll.u32 %s335_s11, 4  ;;  %s17_s10 = int_to_ptr.vmem [resolvable:$true] %s16_s10  ;;  %s354_s12 = int_to_ptr.vmem [resolvable:$true] %s25_s12 }
   0x4   :  { %s262_s15 = scalar_lea.hbm %s397_s0, 256 }
   0x5   :  { %p263_p0 = scmp.ne.s32.totalorder %s397_s0, %s262_s15  ;;  %p266_p1 = scmp.lt.u32.totalorder %s262_s15, %s397_s0 }
   0x7   :  { %p268_p2 = pnand %p266_p1, %p263_p0 }
   0x9   :  { %271 = shalt.err (!%p268_p2)
}
   0xa   :  { %s272_s20 = scalar_lea.vmem %s17_s10, 256  ;;  %p277_p4 = scmp.lt.s32.totalorder %s17_s10, %s17_s10 }
   0xb   :  { %p273_p3 = scmp.ne.s32.totalorder %s17_s10, %s272_s20  ;;  %p278_p5 = scmp.lt.s32.totalorder %s272_s20, %s272_s20 }
   0xd   :  { %p279_p6 = por %p278_p5, %p277_p4 }
   0xf   :  { %p280_p7 = pnand %p279_p6, %p273_p3 }
  0x11   :  { %283 = shalt.err (!%p280_p7)
}
  0x12   :  { %19 = dma.hbm_to_vmem [thread:$0]  %s397_s0, 256, %s17_s10, [#allocation3]  }
  0x13   :  { %s284_s25 = scalar_lea.hbm %s398_s1, 8192 }
  0x14   :  { %p285_p8 = scmp.ne.s32.totalorder %s398_s1, %s284_s25  ;;  %p288_p9 = scmp.lt.u32.totalorder %s284_s25, %s398_s1 }
  0x16   :  { %p290_p10 = pnand %p288_p9, %p285_p8 }
  0x18   :  { %293 = shalt.err (!%p290_p10)
}
  0x19   :  { %s294_s30 = scalar_lea.vmem %s354_s12, 8192  ;;  %p299_p12 = scmp.lt.s32.totalorder %s354_s12, %s354_s12 }
  0x1a   :  { %p295_p11 = scmp.ne.s32.totalorder %s354_s12, %s294_s30  ;;  %p300_p13 = scmp.lt.s32.totalorder %s294_s30, %s294_s30 }
  0x1c   :  { %p301_p0 = por %p300_p13, %p299_p12 }
  0x1e   :  { %p302_p1 = pnand %p301_p0, %p295_p11 }
  0x20   :  { %305 = shalt.err (!%p302_p1)
}
  0x21   :  { %s336_s0 = smov 256   ;;  %s337_s3 = smov 16  }
  0x22   :  { %31 = dma.hbm_to_vmem [thread:$0]  %s398_s1, 8192, %s354_s12, [#allocation6], %s336_s0, %s336_s0, %s337_s3  }
  0x23   :  { %328 = dma.done.wait [#allocation3], 256  }
  0x24   :  { %329 = vsyncadd [#allocation3], 4294967040 }
  0x25   :  { %330 = dma.done.wait [#allocation6], 8192  }
  0x26   :  { %331 = vsyncadd [#allocation6], 4294959104  ;;  %v41_v0 = vld [vmem:[#allocation5 + $0x8] sm:$0xff]  ;;  %v43_v1 = vld [vmem:[#allocation5 + $0x18] sm:$0xff]  ;;  %s338_s1 = smov [#allocation7]  }
  0x27   :  { %v40_v2 = vld [vmem:[#allocation5] sm:$0xff]  ;;  %v193_v3 = vpack.c.bf16 %v43_v1, %v41_v0  ;;  %v42_v4 = vld [vmem:[#allocation5 + $0x10] sm:$0xff]  ;;  %v45_v5 = vld [vmem:[#allocation5 + $0x28] sm:$0xff]  ;;  %s183_s6 = sshll.u32 %s338_s1, 4  ;;  %s184_s6 = int_to_ptr.vmem [resolvable:$true] %s183_s6 }
  0x28   :  { %v47_v6 = vld [vmem:[#allocation5 + $0x38] sm:$0xff]  ;;  %v195_v7 = vpack.c.bf16 %v42_v4, %v40_v2  ;;  %v44_v9 = vld [vmem:[#allocation5 + $0x20] sm:$0xff]  ;;  %v46_v10 = vld [vmem:[#allocation5 + $0x30] sm:$0xff]  ;;  %s306_s7 = scalar_lea.vmem %s184_s6, 256  ;;  %p311_p3 = scmp.lt.s32.totalorder %s184_s6, %s184_s6 }
  0x29   :  { %v197_v8 = vpack.c.bf16 %v47_v6, %v45_v5  ;;  %v49_v11 = vld [vmem:[#allocation5 + $0x48] sm:$0xff]  ;;  %194 = vmatprep.subr.bf16.mxu0 %v193_v3  ;;  %v51_v12 = vld [vmem:[#allocation5 + $0x58] sm:$0xff]  ;;  %v199_v13 = vpack.c.bf16 %v46_v10, %v44_v9  ;;  %v48_v15 = vld [vmem:[#allocation5 + $0x40] sm:$0xff]  ;;  %p307_p2 = scmp.ne.s32.totalorder %s184_s6, %s306_s7  ;;  %p312_p4 = scmp.lt.s32.totalorder %s306_s7, %s306_s7 }
  0x2a   :  { %196 = vmatpush1.bf16.msra.mxu0 %v195_v7  ;;  %v201_v14 = vpack.c.bf16 %v51_v12, %v49_v11  ;;  %v50_v16 = vld [vmem:[#allocation5 + $0x50] sm:$0xff]  ;;  %v53_v17 = vld [vmem:[#allocation5 + $0x68] sm:$0xff]  ;;  %v55_v18 = vld [vmem:[#allocation5 + $0x78] sm:$0xff] }
  0x2b   :  { %198 = vmatprep.subr.bf16.mxu0 %v197_v8  ;;  %v203_v19 = vpack.c.bf16 %v50_v16, %v48_v15  ;;  %v205_v20 = vpack.c.bf16 %v55_v18, %v53_v17  ;;  %v52_v21 = vld [vmem:[#allocation5 + $0x60] sm:$0xff]  ;;  %v54_v22 = vld [vmem:[#allocation5 + $0x70] sm:$0xff]  ;;  %v57_v23 = vld [vmem:[#allocation5 + $0x88] sm:$0xff]  ;;  %p313_p5 = por %p312_p4, %p311_p3 }
  0x2c   :  { %v59_v24 = vld [vmem:[#allocation5 + $0x98] sm:$0xff]  ;;  %v207_v25 = vpack.c.bf16 %v54_v22, %v52_v21  ;;  %v56_v27 = vld [vmem:[#allocation5 + $0x80] sm:$0xff]  ;;  %v58_v28 = vld [vmem:[#allocation5 + $0x90] sm:$0xff] }
  0x2d   :  { %v209_v26 = vpack.c.bf16 %v59_v24, %v57_v23  ;;  %v61_v29 = vld [vmem:[#allocation5 + $0xa8] sm:$0xff]  ;;  %v63_v30 = vld [vmem:[#allocation5 + $0xb8] sm:$0xff]  ;;  %v211_v31 = vpack.c.bf16 %v58_v28, %v56_v27  ;;  %v60_v33 = vld [vmem:[#allocation5 + $0xa0] sm:$0xff]  ;;  %p314_p6 = pnand %p313_p5, %p307_p2 }
  0x2e   :  { %200 = vmatpush1.bf16.msra.mxu0 %v199_v13  ;;  %v213_v32 = vpack.c.bf16 %v63_v30, %v61_v29  ;;  %v62_v34 = vld [vmem:[#allocation5 + $0xb0] sm:$0xff]  ;;  %v65_v35 = vld [vmem:[#allocation5 + $0xc8] sm:$0xff]  ;;  %v67_v36 = vld [vmem:[#allocation5 + $0xd8] sm:$0xff] }
  0x2f   :  { %202 = vmatprep.subr.bf16.mxu0 %v201_v14  ;;  %v215_v37 = vpack.c.bf16 %v62_v34, %v60_v33  ;;  %v217_v38 = vpack.c.bf16 %v67_v36, %v65_v35  ;;  %v64_v39 = vld [vmem:[#allocation5 + $0xc0] sm:$0xff]  ;;  %v66_v40 = vld [vmem:[#allocation5 + $0xd0] sm:$0xff]  ;;  %v39_v41 = vld [vmem:[#allocation2 + $0x8] sm:$0xff] }
  0x30   :  { %v69_v42 = vld [vmem:[#allocation5 + $0xe8] sm:$0xff]  ;;  %v71_v43 = vld [vmem:[#allocation5 + $0xf8] sm:$0xff]  ;;  %168 = vmatprep.mubr.f32.mxu0 %v39_v41  ;;  %v219_v44 = vpack.c.bf16 %v66_v40, %v64_v39  ;;  %v68_v46 = vld [vmem:[#allocation5 + $0xe0] sm:$0xff] }
  0x31   :  { %v221_v45 = vpack.c.bf16 %v71_v43, %v69_v42  ;;  %v70_v47 = vld [vmem:[#allocation5 + $0xf0] sm:$0xff]  ;;  %v73_v48 = vld [vmem:[#allocation5 + $0x108] sm:$0xff]  ;;  %v75_v49 = vld [vmem:[#allocation5 + $0x118] sm:$0xff] }
  0x32   :  { %204 = vmatpush1.bf16.msra.mxu0 %v203_v19  ;;  %v223_v50 = vpack.c.bf16 %v70_v47, %v68_v46  ;;  %v225_v51 = vpack.c.bf16 %v75_v49, %v73_v48  ;;  %v72_v52 = vld [vmem:[#allocation5 + $0x100] sm:$0xff]  ;;  %v74_v53 = vld [vmem:[#allocation5 + $0x110] sm:$0xff]  ;;  %v77_v54 = vld [vmem:[#allocation5 + $0x128] sm:$0xff] }
  0x33   :  { %206 = vmatprep.subr.bf16.mxu0 %v205_v20  ;;  %v79_v55 = vld [vmem:[#allocation5 + $0x138] sm:$0xff]  ;;  %v227_v56 = vpack.c.bf16 %v74_v53, %v72_v52  ;;  %v76_v58 = vld [vmem:[#allocation5 + $0x120] sm:$0xff]  ;;  %v78_v59 = vld [vmem:[#allocation5 + $0x130] sm:$0xff] }
  0x34   :  { %v229_v57 = vpack.c.bf16 %v79_v55, %v77_v54  ;;  %v81_v60 = vld [vmem:[#allocation5 + $0x148] sm:$0xff]  ;;  %v83_v61 = vld [vmem:[#allocation5 + $0x158] sm:$0xff]  ;;  %v231_v62 = vpack.c.bf16 %v78_v59, %v76_v58  ;;  %v80_v0 = vld [vmem:[#allocation5 + $0x140] sm:$0xff] }
  0x35   :  { %v233_v63 = vpack.c.bf16 %v83_v61, %v81_v60  ;;  %v82_v1 = vld [vmem:[#allocation5 + $0x150] sm:$0xff]  ;;  %v85_v2 = vld [vmem:[#allocation5 + $0x168] sm:$0xff]  ;;  %v87_v3 = vld [vmem:[#allocation5 + $0x178] sm:$0xff] }
  0x36   :  { %208 = vmatpush1.bf16.msra.mxu0 %v207_v25  ;;  %v235_v4 = vpack.c.bf16 %v82_v1, %v80_v0  ;;  %v237_v5 = vpack.c.bf16 %v87_v3, %v85_v2  ;;  %v84_v6 = vld [vmem:[#allocation5 + $0x160] sm:$0xff]  ;;  %v86_v7 = vld [vmem:[#allocation5 + $0x170] sm:$0xff]  ;;  %v89_v8 = vld [vmem:[#allocation5 + $0x188] sm:$0xff] }
  0x37   :  { %210 = vmatprep.subr.bf16.mxu0 %v209_v26  ;;  %v91_v9 = vld [vmem:[#allocation5 + $0x198] sm:$0xff]  ;;  %v239_v10 = vpack.c.bf16 %v86_v7, %v84_v6  ;;  %v88_v12 = vld [vmem:[#allocation5 + $0x180] sm:$0xff]  ;;  %v90_v13 = vld [vmem:[#allocation5 + $0x190] sm:$0xff] }
  0x38   :  { %v241_v11 = vpack.c.bf16 %v91_v9, %v89_v8  ;;  %v93_v14 = vld [vmem:[#allocation5 + $0x1a8] sm:$0xff]  ;;  %v95_v15 = vld [vmem:[#allocation5 + $0x1b8] sm:$0xff]  ;;  %v243_v16 = vpack.c.bf16 %v90_v13, %v88_v12  ;;  %v92_v18 = vld [vmem:[#allocation5 + $0x1a0] sm:$0xff] }
  0x39   :  { %v245_v17 = vpack.c.bf16 %v95_v15, %v93_v14  ;;  %v94_v19 = vld [vmem:[#allocation5 + $0x1b0] sm:$0xff]  ;;  %v97_v20 = vld [vmem:[#allocation5 + $0x1c8] sm:$0xff]  ;;  %v99_v21 = vld [vmem:[#allocation5 + $0x1d8] sm:$0xff] }
  0x3a   :  { %212 = vmatpush1.bf16.msra.mxu0 %v211_v31  ;;  %v247_v22 = vpack.c.bf16 %v94_v19, %v92_v18  ;;  %v249_v23 = vpack.c.bf16 %v99_v21, %v97_v20  ;;  %v96_v24 = vld [vmem:[#allocation5 + $0x1c0] sm:$0xff]  ;;  %v98_v25 = vld [vmem:[#allocation5 + $0x1d0] sm:$0xff]  ;;  %v101_v26 = vld [vmem:[#allocation5 + $0x1e8] sm:$0xff] }
  0x3b   :  { %214 = vmatprep.subr.bf16.mxu0 %v213_v32  ;;  %v103_v27 = vld [vmem:[#allocation5 + $0x1f8] sm:$0xff]  ;;  %v251_v28 = vpack.c.bf16 %v98_v25, %v96_v24  ;;  %v100_v30 = vld [vmem:[#allocation5 + $0x1e0] sm:$0xff]  ;;  %v102_v31 = vld [vmem:[#allocation5 + $0x1f0] sm:$0xff] }
  0x3c   :  { %v253_v29 = vpack.c.bf16 %v103_v27, %v101_v26  ;;  %v255_v32 = vpack.c.bf16 %v102_v31, %v100_v30  ;;  %v38_v33 = vld [vmem:[#allocation2] sm:$0xff] }
  0x3e   :  { %216 = vmatpush1.bf16.msra.mxu0 %v215_v37 }
  0x3f   :  { %218 = vmatprep.subr.bf16.mxu0 %v217_v38 }
  0x42   :  { %220 = vmatpush1.bf16.msra.mxu0 %v219_v44 }
  0x43   :  { %222 = vmatprep.subr.bf16.mxu0 %v221_v45 }
  0x46   :  { %224 = vmatpush1.bf16.msra.mxu0 %v223_v50 }
  0x47   :  { %226 = vmatprep.subr.bf16.mxu0 %v225_v51 }
  0x4a   :  { %228 = vmatpush1.bf16.msra.mxu0 %v227_v56 }
  0x4b   :  { %230 = vmatprep.subr.bf16.mxu0 %v229_v57 }
  0x4e   :  { %232 = vmatpush1.bf16.msra.mxu0 %v231_v62 }
  0x4f   :  { %234 = vmatprep.subr.bf16.mxu0 %v233_v63 }
  0x52   :  { %236 = vmatpush1.bf16.msra.mxu0 %v235_v4 }
  0x53   :  { %238 = vmatprep.subr.bf16.mxu0 %v237_v5 }
  0x56   :  { %240 = vmatpush1.bf16.msra.mxu0 %v239_v10 }
  0x57   :  { %242 = vmatprep.subr.bf16.mxu0 %v241_v11 }
  0x5a   :  { %244 = vmatpush1.bf16.msra.mxu0 %v243_v16 }
  0x5b   :  { %246 = vmatprep.subr.bf16.mxu0 %v245_v17 }
  0x5e   :  { %248 = vmatpush1.bf16.msra.mxu0 %v247_v22 }
  0x5f   :  { %250 = vmatprep.subr.bf16.mxu0 %v249_v23 }
  0x62   :  { %252 = vmatpush1.bf16.msra.mxu0 %v251_v28 }
  0x63   :  { %254 = vmatprep.subr.bf16.mxu0 %v253_v29 }
  0x66   :  { %256 = vmatpush1.bf16.msra.mxu0 %v255_v32 }
  0x69   :  { %169 = vmatmul.mubr.f32.vlgmr.msra.gmra.mrb[0].mxu0 %v38_v33 }
 0x13c   :  { %v170_v34 = vpop.f32.mrb[0].mxu0 }
 0x13d   :  { %175 = vst [vmem:[#allocation7] sm:$0xff] %v170_v34  ;;  %v172_v35 = vpop.f32.mrb[1].mxu0 }
 0x13e   :  { %176 = vst [vmem:[#allocation7 + $0x8] sm:$0xff] %v172_v35 }
 0x13f   :  { %317 = shalt.err (!%p314_p6)
}
 0x140   :  { %s318_s10 = scalar_lea.hbm %s399_s2, 256 }
 0x141   :  { %p319_p7 = scmp.ne.s32.totalorder %s399_s2, %s318_s10  ;;  %p322_p8 = scmp.lt.u32.totalorder %s318_s10, %s399_s2 }
 0x143   :  { %p324_p9 = pnand %p322_p8, %p319_p7 }
 0x145   :  { %327 = shalt.err (!%p324_p9)
}
 0x146   :  { %186 = dma.vmem_to_hbm [thread:$0]  %s184_s6, 256, %s399_s2, [#allocation4]  }
 0x147   :  { %332 = dma.done.wait [#allocation4], 256  }
 0x148   :  { %333 = vsyncadd [#allocation4], 4294967040 }
 0x149   :  { %190 = vsyncpa [#allocation3], 1 }
 0x14a   :  { %191 = vsyncpa [#allocation6], 1 }
 0x14b   :  { %192 = vsyncpa [#allocation4], 1 }

// kernel: tpu_custom_call.1
= control target key start
LH: loop header
LB: loop body
LE: loop exit
PB: predicated region body
PF: predicated region fallthrough
CT: control target
= control target key end

     0   :  { %7 = vsyncpa [#allocation3], 0  ;;  %s397_s0 = inlined_call_operand.hbm [shape: f32[1,8,256], index: 0, kind: input, shape index: {}]   ;;  %s398_s1 = inlined_call_operand.hbm [shape: f32[256,256], index: 1, kind: input, shape index: {}]   ;;  %s399_s2 = inlined_call_operand.hbm [shape: f32[1,8,256], index: 2, kind: output, shape index: {}]  }
   0x1   :  { %8 = vsyncpa [#allocation6], 0 }
   0x2   :  { %9 = vsyncpa [#allocation4], 0  ;;  %s334_s9 = smov [#allocation2]   ;;  %s335_s11 = smov [#allocation5]  }
   0x3   :  { %s16_s10 = sshll.u32 %s334_s9, 4  ;;  %s25_s12 = sshll.u32 %s335_s11, 4  ;;  %s17_s10 = int_to_ptr.vmem [resolvable:$true] %s16_s10  ;;  %s354_s12 = int_to_ptr.vmem [resolvable:$true] %s25_s12 }
   0x4   :  { %s262_s15 = scalar_lea.hbm %s397_s0, 256 }
   0x5   :  { %p263_p0 = scmp.ne.s32.totalorder %s397_s0, %s262_s15  ;;  %p266_p1 = scmp.lt.u32.totalorder %s262_s15, %s397_s0 }
   0x7   :  { %p268_p2 = pnand %p266_p1, %p263_p0 }
   0x9   :  { %271 = shalt.err (!%p268_p2)
}
   0xa   :  { %s272_s20 = scalar_lea.vmem %s17_s10, 256  ;;  %p277_p4 = scmp.lt.s32.totalorder %s17_s10, %s17_s10 }
   0xb   :  { %p273_p3 = scmp.ne.s32.totalorder %s17_s10, %s272_s20  ;;  %p278_p5 = scmp.lt.s32.totalorder %s272_s20, %s272_s20 }
   0xd   :  { %p279_p6 = por %p278_p5, %p277_p4 }
   0xf   :  { %p280_p7 = pnand %p279_p6, %p273_p3 }
  0x11   :  { %283 = shalt.err (!%p280_p7)
}
  0x12   :  { %19 = dma.hbm_to_vmem [thread:$0]  %s397_s0, 256, %s17_s10, [#allocation3]  }
  0x13   :  { %s284_s25 = scalar_lea.hbm %s398_s1, 8192 }
  0x14   :  { %p285_p8 = scmp.ne.s32.totalorder %s398_s1, %s284_s25  ;;  %p288_p9 = scmp.lt.u32.totalorder %s284_s25, %s398_s1 }
  0x16   :  { %p290_p10 = pnand %p288_p9, %p285_p8 }
  0x18   :  { %293 = shalt.err (!%p290_p10)
}
  0x19   :  { %s294_s30 = scalar_lea.vmem %s354_s12, 8192  ;;  %p299_p12 = scmp.lt.s32.totalorder %s354_s12, %s354_s12 }
  0x1a   :  { %p295_p11 = scmp.ne.s32.totalorder %s354_s12, %s294_s30  ;;  %p300_p13 = scmp.lt.s32.totalorder %s294_s30, %s294_s30 }
  0x1c   :  { %p301_p0 = por %p300_p13, %p299_p12 }
  0x1e   :  { %p302_p1 = pnand %p301_p0, %p295_p11 }
  0x20   :  { %305 = shalt.err (!%p302_p1)
}
  0x21   :  { %s336_s0 = smov 256   ;;  %s337_s3 = smov 16  }
  0x22   :  { %31 = dma.hbm_to_vmem [thread:$0]  %s398_s1, 8192, %s354_s12, [#allocation6], %s336_s0, %s336_s0, %s337_s3  }
  0x23   :  { %328 = dma.done.wait [#allocation3], 256  }
  0x24   :  { %329 = vsyncadd [#allocation3], 4294967040 }
  0x25   :  { %330 = dma.done.wait [#allocation6], 8192  }
  0x26   :  { %331 = vsyncadd [#allocation6], 4294959104  ;;  %v41_v0 = vld [vmem:[#allocation5 + $0x8] sm:$0xff]  ;;  %v43_v1 = vld [vmem:[#allocation5 + $0x18] sm:$0xff]  ;;  %s338_s1 = smov [#allocation7]  }
  0x27   :  { %v40_v2 = vld [vmem:[#allocation5] sm:$0xff]  ;;  %v193_v3 = vpack.c.bf16 %v43_v1, %v41_v0  ;;  %v42_v4 = vld [vmem:[#allocation5 + $0x10] sm:$0xff]  ;;  %v45_v5 = vld [vmem:[#allocation5 + $0x28] sm:$0xff]  ;;  %s183_s6 = sshll.u32 %s338_s1, 4  ;;  %s184_s6 = int_to_ptr.vmem [resolvable:$true] %s183_s6 }
  0x28   :  { %v47_v6 = vld [vmem:[#allocation5 + $0x38] sm:$0xff]  ;;  %v195_v7 = vpack.c.bf16 %v42_v4, %v40_v2  ;;  %v44_v9 = vld [vmem:[#allocation5 + $0x20] sm:$0xff]  ;;  %v46_v10 = vld [vmem:[#allocation5 + $0x30] sm:$0xff]  ;;  %s306_s7 = scalar_lea.vmem %s184_s6, 256  ;;  %p311_p3 = scmp.lt.s32.totalorder %s184_s6, %s184_s6 }
  0x29   :  { %v197_v8 = vpack.c.bf16 %v47_v6, %v45_v5  ;;  %v49_v11 = vld [vmem:[#allocation5 + $0x48] sm:$0xff]  ;;  %194 = vmatprep.subr.bf16.mxu0 %v193_v3  ;;  %v51_v12 = vld [vmem:[#allocation5 + $0x58] sm:$0xff]  ;;  %v199_v13 = vpack.c.bf16 %v46_v10, %v44_v9  ;;  %v48_v15 = vld [vmem:[#allocation5 + $0x40] sm:$0xff]  ;;  %p307_p2 = scmp.ne.s32.totalorder %s184_s6, %s306_s7  ;;  %p312_p4 = scmp.lt.s32.totalorder %s306_s7, %s306_s7 }
  0x2a   :  { %196 = vmatpush1.bf16.msra.mxu0 %v195_v7  ;;  %v201_v14 = vpack.c.bf16 %v51_v12, %v49_v11  ;;  %v50_v16 = vld [vmem:[#allocation5 + $0x50] sm:$0xff]  ;;  %v53_v17 = vld [vmem:[#allocation5 + $0x68] sm:$0xff]  ;;  %v55_v18 = vld [vmem:[#allocation5 + $0x78] sm:$0xff] }
  0x2b   :  { %198 = vmatprep.subr.bf16.mxu0 %v197_v8  ;;  %v203_v19 = vpack.c.bf16 %v50_v16, %v48_v15  ;;  %v205_v20 = vpack.c.bf16 %v55_v18, %v53_v17  ;;  %v52_v21 = vld [vmem:[#allocation5 + $0x60] sm:$0xff]  ;;  %v54_v22 = vld [vmem:[#allocation5 + $0x70] sm:$0xff]  ;;  %v57_v23 = vld [vmem:[#allocation5 + $0x88] sm:$0xff]  ;;  %p313_p5 = por %p312_p4, %p311_p3 }
  0x2c   :  { %v59_v24 = vld [vmem:[#allocation5 + $0x98] sm:$0xff]  ;;  %v207_v25 = vpack.c.bf16 %v54_v22, %v52_v21  ;;  %v56_v27 = vld [vmem:[#allocation5 + $0x80] sm:$0xff]  ;;  %v58_v28 = vld [vmem:[#allocation5 + $0x90] sm:$0xff] }
  0x2d   :  { %v209_v26 = vpack.c.bf16 %v59_v24, %v57_v23  ;;  %v61_v29 = vld [vmem:[#allocation5 + $0xa8] sm:$0xff]  ;;  %v63_v30 = vld [vmem:[#allocation5 + $0xb8] sm:$0xff]  ;;  %v211_v31 = vpack.c.bf16 %v58_v28, %v56_v27  ;;  %v60_v33 = vld [vmem:[#allocation5 + $0xa0] sm:$0xff]  ;;  %p314_p6 = pnand %p313_p5, %p307_p2 }
  0x2e   :  { %200 = vmatpush1.bf16.msra.mxu0 %v199_v13  ;;  %v213_v32 = vpack.c.bf16 %v63_v30, %v61_v29  ;;  %v62_v34 = vld [vmem:[#allocation5 + $0xb0] sm:$0xff]  ;;  %v65_v35 = vld [vmem:[#allocation5 + $0xc8] sm:$0xff]  ;;  %v67_v36 = vld [vmem:[#allocation5 + $0xd8] sm:$0xff] }
  0x2f   :  { %202 = vmatprep.subr.bf16.mxu0 %v201_v14  ;;  %v215_v37 = vpack.c.bf16 %v62_v34, %v60_v33  ;;  %v217_v38 = vpack.c.bf16 %v67_v36, %v65_v35  ;;  %v64_v39 = vld [vmem:[#allocation5 + $0xc0] sm:$0xff]  ;;  %v66_v40 = vld [vmem:[#allocation5 + $0xd0] sm:$0xff]  ;;  %v39_v41 = vld [vmem:[#allocation2 + $0x8] sm:$0xff] }
  0x30   :  { %v69_v42 = vld [vmem:[#allocation5 + $0xe8] sm:$0xff]  ;;  %v71_v43 = vld [vmem:[#allocation5 + $0xf8] sm:$0xff]  ;;  %168 = vmatprep.mubr.f32.mxu0 %v39_v41  ;;  %v219_v44 = vpack.c.bf16 %v66_v40, %v64_v39  ;;  %v68_v46 = vld [vmem:[#allocation5 + $0xe0] sm:$0xff] }
  0x31   :  { %v221_v45 = vpack.c.bf16 %v71_v43, %v69_v42  ;;  %v70_v47 = vld [vmem:[#allocation5 + $0xf0] sm:$0xff]  ;;  %v73_v48 = vld [vmem:[#allocation5 + $0x108] sm:$0xff]  ;;  %v75_v49 = vld [vmem:[#allocation5 + $0x118] sm:$0xff] }
  0x32   :  { %204 = vmatpush1.bf16.msra.mxu0 %v203_v19  ;;  %v223_v50 = vpack.c.bf16 %v70_v47, %v68_v46  ;;  %v225_v51 = vpack.c.bf16 %v75_v49, %v73_v48  ;;  %v72_v52 = vld [vmem:[#allocation5 + $0x100] sm:$0xff]  ;;  %v74_v53 = vld [vmem:[#allocation5 + $0x110] sm:$0xff]  ;;  %v77_v54 = vld [vmem:[#allocation5 + $0x128] sm:$0xff] }
  0x33   :  { %206 = vmatprep.subr.bf16.mxu0 %v205_v20  ;;  %v79_v55 = vld [vmem:[#allocation5 + $0x138] sm:$0xff]  ;;  %v227_v56 = vpack.c.bf16 %v74_v53, %v72_v52  ;;  %v76_v58 = vld [vmem:[#allocation5 + $0x120] sm:$0xff]  ;;  %v78_v59 = vld [vmem:[#allocation5 + $0x130] sm:$0xff] }
  0x34   :  { %v229_v57 = vpack.c.bf16 %v79_v55, %v77_v54  ;;  %v81_v60 = vld [vmem:[#allocation5 + $0x148] sm:$0xff]  ;;  %v83_v61 = vld [vmem:[#allocation5 + $0x158] sm:$0xff]  ;;  %v231_v62 = vpack.c.bf16 %v78_v59, %v76_v58  ;;  %v80_v0 = vld [vmem:[#allocation5 + $0x140] sm:$0xff] }
  0x35   :  { %v233_v63 = vpack.c.bf16 %v83_v61, %v81_v60  ;;  %v82_v1 = vld [vmem:[#allocation5 + $0x150] sm:$0xff]  ;;  %v85_v2 = vld [vmem:[#allocation5 + $0x168] sm:$0xff]  ;;  %v87_v3 = vld [vmem:[#allocation5 + $0x178] sm:$0xff] }
  0x36   :  { %208 = vmatpush1.bf16.msra.mxu0 %v207_v25  ;;  %v235_v4 = vpack.c.bf16 %v82_v1, %v80_v0  ;;  %v237_v5 = vpack.c.bf16 %v87_v3, %v85_v2  ;;  %v84_v6 = vld [vmem:[#allocation5 + $0x160] sm:$0xff]  ;;  %v86_v7 = vld [vmem:[#allocation5 + $0x170] sm:$0xff]  ;;  %v89_v8 = vld [vmem:[#allocation5 + $0x188] sm:$0xff] }
  0x37   :  { %210 = vmatprep.subr.bf16.mxu0 %v209_v26  ;;  %v91_v9 = vld [vmem:[#allocation5 + $0x198] sm:$0xff]  ;;  %v239_v10 = vpack.c.bf16 %v86_v7, %v84_v6  ;;  %v88_v12 = vld [vmem:[#allocation5 + $0x180] sm:$0xff]  ;;  %v90_v13 = vld [vmem:[#allocation5 + $0x190] sm:$0xff] }
  0x38   :  { %v241_v11 = vpack.c.bf16 %v91_v9, %v89_v8  ;;  %v93_v14 = vld [vmem:[#allocation5 + $0x1a8] sm:$0xff]  ;;  %v95_v15 = vld [vmem:[#allocation5 + $0x1b8] sm:$0xff]  ;;  %v243_v16 = vpack.c.bf16 %v90_v13, %v88_v12  ;;  %v92_v18 = vld [vmem:[#allocation5 + $0x1a0] sm:$0xff] }
  0x39   :  { %v245_v17 = vpack.c.bf16 %v95_v15, %v93_v14  ;;  %v94_v19 = vld [vmem:[#allocation5 + $0x1b0] sm:$0xff]  ;;  %v97_v20 = vld [vmem:[#allocation5 + $0x1c8] sm:$0xff]  ;;  %v99_v21 = vld [vmem:[#allocation5 + $0x1d8] sm:$0xff] }
  0x3a   :  { %212 = vmatpush1.bf16.msra.mxu0 %v211_v31  ;;  %v247_v22 = vpack.c.bf16 %v94_v19, %v92_v18  ;;  %v249_v23 = vpack.c.bf16 %v99_v21, %v97_v20  ;;  %v96_v24 = vld [vmem:[#allocation5 + $0x1c0] sm:$0xff]  ;;  %v98_v25 = vld [vmem:[#allocation5 + $0x1d0] sm:$0xff]  ;;  %v101_v26 = vld [vmem:[#allocation5 + $0x1e8] sm:$0xff] }
  0x3b   :  { %214 = vmatprep.subr.bf16.mxu0 %v213_v32  ;;  %v103_v27 = vld [vmem:[#allocation5 + $0x1f8] sm:$0xff]  ;;  %v251_v28 = vpack.c.bf16 %v98_v25, %v96_v24  ;;  %v100_v30 = vld [vmem:[#allocation5 + $0x1e0] sm:$0xff]  ;;  %v102_v31 = vld [vmem:[#allocation5 + $0x1f0] sm:$0xff] }
  0x3c   :  { %v253_v29 = vpack.c.bf16 %v103_v27, %v101_v26  ;;  %v255_v32 = vpack.c.bf16 %v102_v31, %v100_v30  ;;  %v38_v33 = vld [vmem:[#allocation2] sm:$0xff] }
  0x3e   :  { %216 = vmatpush1.bf16.msra.mxu0 %v215_v37 }
  0x3f   :  { %218 = vmatprep.subr.bf16.mxu0 %v217_v38 }
  0x42   :  { %220 = vmatpush1.bf16.msra.mxu0 %v219_v44 }
  0x43   :  { %222 = vmatprep.subr.bf16.mxu0 %v221_v45 }
  0x46   :  { %224 = vmatpush1.bf16.msra.mxu0 %v223_v50 }
  0x47   :  { %226 = vmatprep.subr.bf16.mxu0 %v225_v51 }
  0x4a   :  { %228 = vmatpush1.bf16.msra.mxu0 %v227_v56 }
  0x4b   :  { %230 = vmatprep.subr.bf16.mxu0 %v229_v57 }
  0x4e   :  { %232 = vmatpush1.bf16.msra.mxu0 %v231_v62 }
  0x4f   :  { %234 = vmatprep.subr.bf16.mxu0 %v233_v63 }
  0x52   :  { %236 = vmatpush1.bf16.msra.mxu0 %v235_v4 }
  0x53   :  { %238 = vmatprep.subr.bf16.mxu0 %v237_v5 }
  0x56   :  { %240 = vmatpush1.bf16.msra.mxu0 %v239_v10 }
  0x57   :  { %242 = vmatprep.subr.bf16.mxu0 %v241_v11 }
  0x5a   :  { %244 = vmatpush1.bf16.msra.mxu0 %v243_v16 }
  0x5b   :  { %246 = vmatprep.subr.bf16.mxu0 %v245_v17 }
  0x5e   :  { %248 = vmatpush1.bf16.msra.mxu0 %v247_v22 }
  0x5f   :  { %250 = vmatprep.subr.bf16.mxu0 %v249_v23 }
  0x62   :  { %252 = vmatpush1.bf16.msra.mxu0 %v251_v28 }
  0x63   :  { %254 = vmatprep.subr.bf16.mxu0 %v253_v29 }
  0x66   :  { %256 = vmatpush1.bf16.msra.mxu0 %v255_v32 }
  0x69   :  { %169 = vmatmul.mubr.f32.vlgmr.msra.gmra.mrb[0].mxu0 %v38_v33 }
 0x13c   :  { %v170_v34 = vpop.f32.mrb[0].mxu0 }
 0x13d   :  { %175 = vst [vmem:[#allocation7] sm:$0xff] %v170_v34  ;;  %v172_v35 = vpop.f32.mrb[1].mxu0 }
 0x13e   :  { %176 = vst [vmem:[#allocation7 + $0x8] sm:$0xff] %v172_v35 }
 0x13f   :  { %317 = shalt.err (!%p314_p6)
}
 0x140   :  { %s318_s10 = scalar_lea.hbm %s399_s2, 256 }
 0x141   :  { %p319_p7 = scmp.ne.s32.totalorder %s399_s2, %s318_s10  ;;  %p322_p8 = scmp.lt.u32.totalorder %s318_s10, %s399_s2 }
 0x143   :  { %p324_p9 = pnand %p322_p8, %p319_p7 }
 0x145   :  { %327 = shalt.err (!%p324_p9)
}
 0x146   :  { %186 = dma.vmem_to_hbm [thread:$0]  %s184_s6, 256, %s399_s2, [#allocation4]  }
 0x147   :  { %332 = dma.done.wait [#allocation4], 256  }
 0x148   :  { %333 = vsyncadd [#allocation4], 4294967040 }
 0x149   :  { %190 = vsyncpa [#allocation3], 1 }
 0x14a   :  { %191 = vsyncpa [#allocation6], 1 }
 0x14b   :  { %192 = vsyncpa [#allocation4], 1 }

</bundles_post_ra>
